<compile_context>
chip_gen: v5e
topology: v5e:2x2
jax: 0.10.0
libtpu: 0.0.40
codegen_flags: <defaults>
</compile_context>

<pallas_src>
import numpy as np
import jax
import jax.numpy as jnp
from jax.experimental import pallas as pl
from jax.experimental.pallas import tpu as pltpu


def _identity_kernel(x_ref, o_ref):
    # Pure pass-through of the current VMEM block.
    o_ref[...] = x_ref[...]


_LANE = 128
# ~2 MiB per block: with default double buffering (2 in + 2 out) that is ~8 MiB
# of VMEM, comfortably under v5e's 16 MiB scoped default and v7x's budget.
_TARGET_BLOCK_BYTES = 2 * 1024 * 1024


def identity(x: jax.Array) -> jax.Array:
    """Pallas identity: y = x (same shape, dtype, values)."""
    total = int(x.size)

    # Identity is a no-op. When a lane-dense tiling is not available (empty
    # array, 0-d scalar, or size not a multiple of 128) the optimal path is to
    # return x directly: zero HBM traffic and exactly the module's semantics.
    if x.ndim == 0 or total == 0 or total % _LANE != 0:
        return x

    # Lane-dense 2-D view: last dim is a big multiple of 128.
    cols = _LANE
    for c in (4096, 2048, 1024, 512, 256, 128):
        if total % c == 0:
            cols = c
            break
    rows = total // cols
    x2 = x.reshape(rows, cols)

    # Pick a tile of ~_TARGET_BLOCK_BYTES; sublane-align (multiple of 32 rows
    # covers f32/bf16/int8 packing) unless the full extent is used.
    itemsize = jnp.dtype(x.dtype).itemsize
    target_rows = max(1, _TARGET_BLOCK_BYTES // (cols * itemsize))
    if target_rows >= rows:
        tile_rows = rows  # full extent: always a legal block dim
    else:
        tile_rows = min(rows, max(32, (target_rows // 32) * 32))
    grid = (pl.cdiv(rows, tile_rows),)

    y2 = pl.pallas_call(
        _identity_kernel,
        out_shape=jax.ShapeDtypeStruct((rows, cols), x.dtype),
        grid=grid,
        in_specs=[pl.BlockSpec((tile_rows, cols), lambda i: (i, 0))],
        out_specs=pl.BlockSpec((tile_rows, cols), lambda i: (i, 0)),
        # Output aliases the input buffer: no extra HBM allocation, and under
        # jit the copy collapses onto the existing buffer.
        input_output_aliases={0: 0},
        compiler_params=pltpu.CompilerParams(
            dimension_semantics=("parallel",),  # lets v7x split across both TCs
        ),
    )(x2)

    return y2.reshape(x.shape)


if __name__ == "__main__":
    key = jax.random.PRNGKey(0)
    x = jax.random.normal(key, (2, 4, 16, 16), dtype=jnp.float32)

    # Snapshot the expected values on the host before the (aliased) call.
    x_host = np.asarray(jax.device_get(x))

    y = identity(x)
    jax.block_until_ready(y)
    y_host = np.asarray(jax.device_get(y))

    assert y_host.shape == x_host.shape, (y_host.shape, x_host.shape)
    assert y.dtype == x.dtype, (y.dtype, x.dtype)
    assert np.array_equal(y_host, x_host), "identity output mismatch"

    print("KERNEL_OK")
</pallas_src>

<mosaic_0001>
module attributes {stable_mosaic.version = 11 : i64} {
  func.func @_identity_kernel(%arg0: i32, %arg1: memref<1x2048xf32, #tpu.memory_space<vmem>>, %arg2: memref<1x2048xf32, #tpu.memory_space<vmem>>) attributes {dimension_semantics = [#tpu.dimension_semantics<parallel>], iteration_bounds = array<i64: 1>, scalar_prefetch = 0 : i64, scratch_operands = 0 : i64, tpu.core_type = #tpu.core_type<tc>, window_params = [{transform_indices = @transform_0, window_bounds = array<i64: 1, 2048>}, {transform_indices = @transform_1, window_bounds = array<i64: 1, 2048>}]} {
    %c0 = arith.constant 0 : index
    %c0_0 = arith.constant 0 : index
    %0 = vector.load %arg1[%c0, %c0_0] : memref<1x2048xf32, #tpu.memory_space<vmem>>, vector<1x2048xf32>
    %c0_1 = arith.constant 0 : index
    %c0_2 = arith.constant 0 : index
    %1 = vector.load %arg2[%c0_1, %c0_2] : memref<1x2048xf32, #tpu.memory_space<vmem>>, vector<1x2048xf32>
    tpu.vector_store %arg2[%c0_1, %c0_2], %0 {strides = array<i32>} : memref<1x2048xf32, #tpu.memory_space<vmem>>, vector<1x2048xf32>,
    return
  }
  func.func @transform_0(%arg0: i32) -> (i32, i32) {
    %c0_i32 = arith.constant 0 : i32
    %c0_i32_0 = arith.constant 0 : i32
    return %arg0, %c0_i32 : i32, i32
  }
  func.func @transform_1(%arg0: i32) -> (i32, i32) {
    %c0_i32 = arith.constant 0 : i32
    %c0_i32_0 = arith.constant 0 : i32
    return %arg0, %c0_i32 : i32, i32
  }
}

</mosaic_0001>

<bundles_post_ra>
// kernel: tpu_custom_call.1
= control target key start
LH: loop header
LB: loop body
LE: loop exit
PB: predicated region body
PF: predicated region fallthrough
CT: control target
= control target key end

     0   :  { %6 = vsyncpa [#allocation3], 0  ;;  %s116_s0 = inlined_call_operand.hbm [shape: f32[1,2048], index: 0, kind: input, shape index: {}, may-alias: {0,1}]   ;;  %s117_s1 = inlined_call_operand.hbm [shape: f32[1,2048], index: 1, kind: output, shape index: {}, may-alias: {0,1}]  }
   0x1   :  { %7 = vsyncpa [#allocation4], 0  ;;  %s13_s8 = sshll.u32 %s116_s0, 4  ;;  %s98_s9 = smov [#allocation2]   ;;  %s14_s8 = int_to_ptr.hbm [resolvable:$true] %s13_s8 }
   0x2   :  { %s15_s10 = sshll.u32 %s98_s9, 4  ;;  %s16_s10 = int_to_ptr.vmem [resolvable:$true] %s15_s10 }
   0x3   :  { %18 = dma.hbm_to_vmem [thread:$0]  %s14_s8, 256, %s16_s10, [#allocation3]  }
   0x4   :  { %94 = dma.done.wait [#allocation3], 256  }
   0x5   :  { %95 = vsyncadd [#allocation3], 4294967040  ;;  %s99_s11 = smov [#allocation5]   ;;  %s34_s15 = sshll.u32 %s117_s1, 4  ;;  %v23_v0 = vld [vmem:[#allocation2] sm:$0xff]  ;;  %v24_v1 = vld [vmem:[#allocation2 + $0x8] sm:$0xff]  ;;  %s35_s15 = int_to_ptr.hbm [resolvable:$true] %s34_s15 }
   0x6   :  { %s32_s12 = sshll.u32 %s99_s11, 4  ;;  %25 = vst [vmem:[#allocation5] sm:$0xff] %v23_v0  ;;  %s33_s12 = int_to_ptr.vmem [resolvable:$true] %s32_s12 }
   0x7   :  { %26 = vst [vmem:[#allocation5 + $0x8] sm:$0xff] %v24_v1 }
   0x8   :  { %37 = dma.vmem_to_hbm [thread:$0]  %s33_s12, 256, %s35_s15, [#allocation4]  }
   0x9   :  { %96 = dma.done.wait [#allocation4], 256  }
   0xa   :  { %97 = vsyncadd [#allocation4], 4294967040 }
   0xb   :  { %42 = vsyncpa [#allocation3], 1 }
   0xc   :  { %43 = vsyncpa [#allocation4], 1 }

</bundles_post_ra>
